<compile_context>
chip_gen: v7x
topology: tpu7x:2x2x1
jax: 0.10.0
libtpu: 0.0.40
codegen_flags: <defaults>
</compile_context>

<pallas_src>
import jax
import jax.numpy as jnp
from jax.experimental import pallas as pl
from jax.experimental.pallas import tpu as pltpu


H1, H2, OUT = 50, 30, 1  # layer widths from the PyTorch module


def mlp_kernel(x_ref, w1_ref, b1_ref, w2_ref, b2_ref, w3t_ref, b3_ref, o_ref):
    """Fused MLP forward for one batch tile.

    x_ref:   (TILE_B, D)   f32 (cast to bf16 here, at the MXU boundary)
    w1_ref:  (D, 50)       bf16
    w2_ref:  (50, 30)      bf16
    b1_ref:  (1, 50), b2_ref: (1, 30)   f32
    w3t_ref: (1, 30), b3_ref: (1, 1)    f32 (layer 3 runs on VPU/XLU, not MXU)
    o_ref:   (TILE_B // 128, 128)       f32 lane-dense output slab
    """
    # Cast x in-kernel (free under MXU slack) instead of a wrapper HBM pass.
    x = x_ref[...].astype(w1_ref.dtype)

    # Layer 1: Linear(D, 50) + ReLU  (MXU, f32 accumulate).
    h1 = jnp.dot(x, w1_ref[...], preferred_element_type=jnp.float32) + b1_ref[...]
    h1 = jnp.maximum(h1, 0.0)
    # Dropout(0.3): identity in eval mode.
    # TODO(synk): training-mode dropout (pltpu.prng_seed + prng_random_bits mask) not emitted.

    # Layer 2: Linear(50, 30) + ReLU.
    h2 = jnp.dot(h1.astype(w2_ref.dtype), w2_ref[...],
                 preferred_element_type=jnp.float32) + b2_ref[...]
    h2 = jnp.maximum(h2, 0.0)

    # Layer 3: Linear(30, 1) as VPU multiply + cross-lane (XLU) reduce.
    # An N=1 MXU matmul wastes the systolic array and forces masked
    # lane-width-1 stores; instead reduce to a vector and store a fully
    # lane-dense (TILE_B//128, 128) slab.
    # NOTE(audit): the (TILE_B,) -> (rows, 128) reshape may lower to a
    # sublane->lane relayout through the XLU; it is small vs the two matmuls
    # and is the price of the lane-dense output layout.
    out_vec = jnp.sum(h2 * w3t_ref[...], axis=-1)          # (TILE_B,)
    out2d = out_vec.reshape(o_ref.shape) + b3_ref[...]      # (rows, 128)
    o_ref[...] = out2d.astype(o_ref.dtype)


def concept_mlp_forward(x, params, *, tile_b=2048, compute_dtype=jnp.bfloat16):
    """x: (B, D) float32; params: PyTorch-layout w1,b1,w2,b2,w3,b3 (biases (1, out))."""
    B, D = x.shape

    # Weights are tiny (<15 KiB total): cast the matmul operands to bf16 once
    # in the wrapper. Biases / layer-3 weights stay f32 (VPU path).
    w1 = params["w1"].astype(compute_dtype)
    w2 = params["w2"].astype(compute_dtype)
    b1 = params["b1"].astype(jnp.float32)
    b2 = params["b2"].astype(jnp.float32)
    w3t = params["w3"].astype(jnp.float32).T          # (1, 30)
    b3 = params["b3"].astype(jnp.float32)             # (1, 1)

    # Tile the batch in 128-row groups. Pad x only to the next multiple of 128
    # (NOT to a tile_b multiple) — the last batch tile may be ragged w.r.t.
    # tile_b; out-of-bounds rows are garbage and get sliced off below.
    slab_rows = pl.cdiv(B, 128)                        # 128-row groups
    b_pad = slab_rows * 128

    tile_rows = max(1, min(tile_b // 128, slab_rows))
    n_tiles = pl.cdiv(slab_rows, tile_rows)
    if n_tiles > 1 and n_tiles % 2 == 1:
        # v7x has 2 TensorCores: prefer an even batch-tile count so the
        # "parallel" grid axis splits evenly (no-op on v5e/v6e, 1 TC).
        tile_rows = pl.cdiv(slab_rows, n_tiles + 1)
        n_tiles = pl.cdiv(slab_rows, tile_rows)
    tile_b = tile_rows * 128

    xp = x if b_pad == B else jnp.pad(x, ((0, b_pad - B), (0, 0)))

    def const_spec(a):
        # Constant block index -> weights/biases stay VMEM-resident across steps.
        return pl.BlockSpec(a.shape, lambda i, _nd=a.ndim: (0,) * _nd)

    param_bytes = sum(int(a.size) * a.dtype.itemsize for a in (w1, b1, w2, b2, w3t, b3))
    cost = pl.CostEstimate(
        flops=2 * B * (D * H1 + H1 * H2 + H2 * OUT),
        transcendentals=0,
        bytes_accessed=B * D * x.dtype.itemsize + b_pad * 4 + param_bytes,
    )

    out_slab = pl.pallas_call(
        mlp_kernel,
        out_shape=jax.ShapeDtypeStruct((slab_rows, 128), jnp.float32),
        grid=(n_tiles,),
        in_specs=[
            pl.BlockSpec((tile_b, D), lambda i: (i, 0)),     # streamed batch tile
            const_spec(w1), const_spec(b1),
            const_spec(w2), const_spec(b2),
            const_spec(w3t), const_spec(b3),
        ],
        out_specs=pl.BlockSpec((tile_rows, 128), lambda i: (i, 0)),
        compiler_params=pltpu.CompilerParams(
            dimension_semantics=("parallel",),   # megacore batch split on v7x
        ),
        cost_estimate=cost,
    )(xp, w1, b1, w2, b2, w3t, b3)

    # (slab_rows, 128) row-major == batch order; back to (B, 1).
    return out_slab.reshape(b_pad, 1)[:B]


def init_params(key, input_dim):
    """Deterministic init mimicking nn.Linear's uniform(-1/sqrt(fan_in), 1/sqrt(fan_in))."""
    dims = [(input_dim, H1), (H1, H2), (H2, OUT)]
    params = {}
    keys = jax.random.split(key, 2 * len(dims))
    for i, (fan_in, fan_out) in enumerate(dims):
        bound = 1.0 / jnp.sqrt(jnp.float32(fan_in))
        params[f"w{i+1}"] = jax.random.uniform(
            keys[2 * i], (fan_in, fan_out), jnp.float32, -bound, bound)
        params[f"b{i+1}"] = jax.random.uniform(
            keys[2 * i + 1], (1, fan_out), jnp.float32, -bound, bound)
    return params


def reference_forward(x, params, compute_dtype=jnp.bfloat16):
    """Pure-JAX reference mirroring the kernel's dtype / reduction policy."""
    w1 = params["w1"].astype(compute_dtype)
    w2 = params["w2"].astype(compute_dtype)
    h1 = jnp.maximum(
        jnp.dot(x.astype(compute_dtype), w1, preferred_element_type=jnp.float32)
        + params["b1"], 0.0)
    h2 = jnp.maximum(
        jnp.dot(h1.astype(compute_dtype), w2, preferred_element_type=jnp.float32)
        + params["b2"], 0.0)
    # Layer 3 as an f32 elementwise multiply + reduce (same as the kernel).
    return jnp.sum(h2 * params["w3"].T, axis=-1, keepdims=True) + params["b3"]


def reference_forward_f32(x, params):
    h1 = jnp.maximum(x @ params["w1"] + params["b1"], 0.0)
    h2 = jnp.maximum(h1 @ params["w2"] + params["b2"], 0.0)
    return h2 @ params["w3"] + params["b3"]


if __name__ == "__main__":
    key = jax.random.PRNGKey(0)
    k_x, k_p, k_x2 = jax.random.split(key, 3)

    input_dim = 32
    params = init_params(k_p, input_dim)

    # Small batch: single (ragged) 128-row tile.
    x_small = jax.random.normal(k_x, (8, input_dim), jnp.float32)
    out_small = jax.block_until_ready(concept_mlp_forward(x_small, params))
    assert out_small.shape == (8, 1)
    assert jnp.allclose(out_small, reference_forward(x_small, params),
                        atol=1e-3, rtol=1e-3)
    assert jnp.allclose(out_small, reference_forward_f32(x_small, params), atol=1e-1)

    # Non-aligned batch with a small tile: multi-tile pipelined grid (even
    # tile count) + ragged last tile w.r.t. tile_b.
    x_big = jax.random.normal(k_x2, (300, input_dim), jnp.float32)
    out_big = jax.block_until_ready(concept_mlp_forward(x_big, params, tile_b=256))
    assert out_big.shape == (300, 1)
    assert jnp.allclose(out_big, reference_forward(x_big, params),
                        atol=1e-3, rtol=1e-3)
    assert jnp.allclose(out_big, reference_forward_f32(x_big, params), atol=1e-1)

    print("KERNEL_OK")
</pallas_src>

<mosaic_0001>
module attributes {stable_mosaic.version = 11 : i64} {
  func.func @mlp_kernel(%arg0: i32, %arg1: memref<128x32xf32, #tpu.memory_space<vmem>>, %arg2: memref<32x50xbf16, #tpu.memory_space<vmem>>, %arg3: memref<1x50xf32, #tpu.memory_space<vmem>>, %arg4: memref<50x30xbf16, #tpu.memory_space<vmem>>, %arg5: memref<1x30xf32, #tpu.memory_space<vmem>>, %arg6: memref<1x30xf32, #tpu.memory_space<vmem>>, %arg7: memref<1x1xf32, #tpu.memory_space<vmem>>, %arg8: memref<1x128xf32, #tpu.memory_space<vmem>>) attributes {dimension_semantics = [#tpu.dimension_semantics<parallel>], iteration_bounds = array<i64: 1>, scalar_prefetch = 0 : i64, scratch_operands = 0 : i64, tpu.core_type = #tpu.core_type<tc>, window_params = [{transform_indices = @transform_0, window_bounds = array<i64: 128, 32>}, {pipeline_mode = #tpu.pipeline_mode<synchronous>, transform_indices = @transform_1, window_bounds = array<i64: 32, 50>}, {pipeline_mode = #tpu.pipeline_mode<synchronous>, transform_indices = @transform_2, window_bounds = array<i64: 1, 50>}, {pipeline_mode = #tpu.pipeline_mode<synchronous>, transform_indices = @transform_3, window_bounds = array<i64: 50, 30>}, {pipeline_mode = #tpu.pipeline_mode<synchronous>, transform_indices = @transform_4, window_bounds = array<i64: 1, 30>}, {pipeline_mode = #tpu.pipeline_mode<synchronous>, transform_indices = @transform_5, window_bounds = array<i64: 1, 30>}, {pipeline_mode = #tpu.pipeline_mode<synchronous>, transform_indices = @transform_6, window_bounds = array<i64: 1, 1>}, {transform_indices = @transform_7, window_bounds = array<i64: 1, 128>}]} {
    %c0 = arith.constant 0 : index
    %c0_0 = arith.constant 0 : index
    %0 = vector.load %arg1[%c0, %c0_0] : memref<128x32xf32, #tpu.memory_space<vmem>>, vector<128x32xf32>
    %1 = arith.truncf %0 : vector<128x32xf32> to vector<128x32xbf16>
    %c0_1 = arith.constant 0 : index
    %c0_2 = arith.constant 0 : index
    %2 = vector.load %arg2[%c0_1, %c0_2] : memref<32x50xbf16, #tpu.memory_space<vmem>>, vector<32x50xbf16>
    %cst = arith.constant dense<0.000000e+00> : vector<128x50xf32>
    %3 = tpu.matmul %1, %2, %cst {dimension_numbers = #tpu.dot_dimension_numbers<[1], [0], [0], [1], [0, 0, 1, 1], [], []>} : vector<128x32xbf16>, vector<32x50xbf16>, vector<128x50xf32> -> vector<128x50xf32>
    %c0_3 = arith.constant 0 : index
    %c0_4 = arith.constant 0 : index
    %4 = vector.load %arg3[%c0_3, %c0_4] : memref<1x50xf32, #tpu.memory_space<vmem>>, vector<1x50xf32>
    %5 = vector.broadcast %4 : vector<1x50xf32> to vector<128x50xf32>
    %6 = arith.addf %3, %5 : vector<128x50xf32>
    %cst_5 = arith.constant 0.000000e+00 : f32
    %7 = vector.broadcast %cst_5 : f32 to vector<128x50xf32>
    %8 = arith.maximumf %6, %7 : vector<128x50xf32>
    %9 = arith.truncf %8 : vector<128x50xf32> to vector<128x50xbf16>
    %c0_6 = arith.constant 0 : index
    %c0_7 = arith.constant 0 : index
    %10 = vector.load %arg4[%c0_6, %c0_7] : memref<50x30xbf16, #tpu.memory_space<vmem>>, vector<50x30xbf16>
    %cst_8 = arith.constant dense<0.000000e+00> : vector<128x30xf32>
    %11 = tpu.matmul %9, %10, %cst_8 {dimension_numbers = #tpu.dot_dimension_numbers<[1], [0], [0], [1], [0, 0, 1, 1], [], []>} : vector<128x50xbf16>, vector<50x30xbf16>, vector<128x30xf32> -> vector<128x30xf32>
    %c0_9 = arith.constant 0 : index
    %c0_10 = arith.constant 0 : index
    %12 = vector.load %arg5[%c0_9, %c0_10] : memref<1x30xf32, #tpu.memory_space<vmem>>, vector<1x30xf32>
    %13 = vector.broadcast %12 : vector<1x30xf32> to vector<128x30xf32>
    %14 = arith.addf %11, %13 : vector<128x30xf32>
    %cst_11 = arith.constant 0.000000e+00 : f32
    %15 = vector.broadcast %cst_11 : f32 to vector<128x30xf32>
    %16 = arith.maximumf %14, %15 : vector<128x30xf32>
    %c0_12 = arith.constant 0 : index
    %c0_13 = arith.constant 0 : index
    %17 = vector.load %arg6[%c0_12, %c0_13] : memref<1x30xf32, #tpu.memory_space<vmem>>, vector<1x30xf32>
    %18 = vector.broadcast %17 : vector<1x30xf32> to vector<128x30xf32>
    %19 = arith.mulf %16, %18 : vector<128x30xf32>
    %cst_14 = arith.constant dense<0.000000e+00> : vector<128xf32>
    %20 = vector.multi_reduction <add>, %19, %cst_14 [1] : vector<128x30xf32> to vector<128xf32>
    %21 = vector.shape_cast %20 : vector<128xf32> to vector<1x128xf32>
    %c0_15 = arith.constant 0 : index
    %c0_16 = arith.constant 0 : index
    %22 = vector.load %arg7[%c0_15, %c0_16] : memref<1x1xf32, #tpu.memory_space<vmem>>, vector<1x1xf32>
    %23 = vector.broadcast %22 : vector<1x1xf32> to vector<1x128xf32>
    %24 = arith.addf %21, %23 : vector<1x128xf32>
    %c0_17 = arith.constant 0 : index
    %c0_18 = arith.constant 0 : index
    %25 = vector.load %arg8[%c0_17, %c0_18] : memref<1x128xf32, #tpu.memory_space<vmem>>, vector<1x128xf32>
    tpu.vector_store %arg8[%c0_17, %c0_18], %24 {strides = array<i32>} : memref<1x128xf32, #tpu.memory_space<vmem>>, vector<1x128xf32>,
    return
  }
  func.func @transform_0(%arg0: i32) -> (i32, i32) {
    %c0_i32 = arith.constant 0 : i32
    %c0_i32_0 = arith.constant 0 : i32
    return %arg0, %c0_i32 : i32, i32
  }
  func.func @transform_1(%arg0: i32) -> (i32, i32) {
    %c0_i32 = arith.constant 0 : i32
    %c0_i32_0 = arith.constant 0 : i32
    %c0_i32_1 = arith.constant 0 : i32
    return %c0_i32, %c0_i32_0 : i32, i32
  }
  func.func @transform_2(%arg0: i32) -> (i32, i32) {
    %c0_i32 = arith.constant 0 : i32
    %c0_i32_0 = arith.constant 0 : i32
    %c0_i32_1 = arith.constant 0 : i32
    return %c0_i32, %c0_i32_0 : i32, i32
  }
  func.func @transform_3(%arg0: i32) -> (i32, i32) {
    %c0_i32 = arith.constant 0 : i32
    %c0_i32_0 = arith.constant 0 : i32
    %c0_i32_1 = arith.constant 0 : i32
    return %c0_i32, %c0_i32_0 : i32, i32
  }
  func.func @transform_4(%arg0: i32) -> (i32, i32) {
    %c0_i32 = arith.constant 0 : i32
    %c0_i32_0 = arith.constant 0 : i32
    %c0_i32_1 = arith.constant 0 : i32
    return %c0_i32, %c0_i32_0 : i32, i32
  }
  func.func @transform_5(%arg0: i32) -> (i32, i32) {
    %c0_i32 = arith.constant 0 : i32
    %c0_i32_0 = arith.constant 0 : i32
    %c0_i32_1 = arith.constant 0 : i32
    return %c0_i32, %c0_i32_0 : i32, i32
  }
  func.func @transform_6(%arg0: i32) -> (i32, i32) {
    %c0_i32 = arith.constant 0 : i32
    %c0_i32_0 = arith.constant 0 : i32
    %c0_i32_1 = arith.constant 0 : i32
    return %c0_i32, %c0_i32_0 : i32, i32
  }
  func.func @transform_7(%arg0: i32) -> (i32, i32) {
    %c0_i32 = arith.constant 0 : i32
    %c0_i32_0 = arith.constant 0 : i32
    return %arg0, %c0_i32 : i32, i32
  }
}

</mosaic_0001>

<bundles_post_ra>
// kernel: tpu_custom_call.1
= control target key start
LH: loop header
LB: loop body
LE: loop exit
PB: predicated region body
PF: predicated region fallthrough
CT: control target
= control target key end

     0   :  { %s1025_s0 = inlined_call_operand.vmem [shape: f32[128,32], index: 0, kind: input, shape index: {}]   ;;  %s1026_s1 = inlined_call_operand.vmem [shape: bf16[32,50], index: 1, kind: input, shape index: {}]   ;;  %s1027_s2 = inlined_call_operand.vmem [shape: f32[1,50], index: 2, kind: input, shape index: {}]   ;;  %s1028_s3 = inlined_call_operand.vmem [shape: bf16[50,30], index: 3, kind: input, shape index: {}]   ;;  %s1029_s4 = inlined_call_operand.vmem [shape: f32[1,30], index: 4, kind: input, shape index: {}]   ;;  %s1030_s5 = inlined_call_operand.vmem [shape: f32[1,30], index: 5, kind: input, shape index: {}]   ;;  %s1031_s6 = inlined_call_operand.<no memory space> [shape: f32[1,1], index: 6, kind: input, shape index: {}]   ;;  %s1032_s7 = inlined_call_operand.hbm [shape: f32[1,128], index: 7, kind: output, shape index: {}]  }
   0x1   :  { %v12_v0 = vstv %s1031_s6 }
   0x2   :  { %13 = vst [vmem:[#allocation2] sm:$0x1] %v12_v0 }
   0x3   :  { %v737_v1 = vld [vmem:[%s1026_s1] sm:$0xff]   ;;  %v738_v2 = vld [vmem:[%s1026_s1 + $0x8] sm:$0xff]   ;;  %vm77_vm0 = vcmask 261120   ;;  %v32_v6 = vld [vmem:[%s1025_s0 + $0x10] sm:$0xff] }
   0x4   :  { %688 = vmatprep.subr.bf16.mxu0 %v737_v1  ;;  %v30_v3 = vld [vmem:[%s1025_s0] sm:$0xff]  ;;  %v31_v4 = vld [vmem:[%s1025_s0 + $0x8] sm:$0xff]  ;;  %v33_v7 = vld [vmem:[%s1025_s0 + $0x18] sm:$0xff] }
   0x5   :  { %689 = vmatpush3.bf16.msra.mxu0 %v737_v1  ;;  %v46_v5 = vpack.c.bf16 %v31_v4, %v30_v3  ;;  %v34_v8 = vld [vmem:[%s1025_s0 + $0x20] sm:$0xff]  ;;  %v35_v9 = vld [vmem:[%s1025_s0 + $0x28] sm:$0xff]  ;;  %v47_v10 = vpack.c.bf16 %v33_v7, %v32_v6 }
   0x6   :  { %690 = vmatprep.subr.bf16.mxu0 %v738_v2  ;;  %v48_v11 = vpack.c.bf16 %v35_v9, %v34_v8  ;;  %v739_v12 = vld [vmem:[%s1028_s3] sm:$0xff]   ;;  %v740_v13 = vld [vmem:[%s1028_s3 + $0x8] sm:$0xff]  }
   0x7   :  { %692 = vmatprep.mubr.msk.bf16.mxu0 %vm77_vm0, %v46_v5  ;;  %708 = vmatprep.subr.bf16.mxu1 %v739_v12 }
   0x9   :  { %691 = vmatpush3.bf16.msra.mxu0 %v738_v2 }
   0xc   :  { %693 = vmatmul.mubr.msk.bf16.vlgmr.msra.gmra.mrb[0].mxu0 %vm77_vm0, %v47_v10 }
   0xd   :  { %14 = vsyncpa [#allocation4], 0  ;;  %696 = vmatprep.mubr.msk.bf16.mxu0 %vm77_vm0, %v48_v11  ;;  %v36_v14 = vld [vmem:[%s1025_s0 + $0x30] sm:$0xff]  ;;  %v37_v15 = vld [vmem:[%s1025_s0 + $0x38] sm:$0xff]  ;;  %709 = vmatpush3.bf16.msra.mxu1 %v739_v12  ;;  %vm283_vm1 = vcmask 1040384   ;;  %vm258_vm2 = vcmask 408576  }
   0xe   :  { %v38_v16 = vld [vmem:[%s1025_s0 + $0x40] sm:$0xff]  ;;  %v39_v17 = vld [vmem:[%s1025_s0 + $0x48] sm:$0xff]  ;;  %710 = vmatprep.subr.bf16.mxu1 %v740_v13  ;;  %v49_v18 = vpack.c.bf16 %v37_v15, %v36_v14  ;;  %v40_v20 = vld [vmem:[%s1025_s0 + $0x50] sm:$0xff]  ;;  %vm423_vm3 = vcmask 244736   ;;  %vm525_vm4 = vcmask 130112   ;;  %vm532_vm5 = vcmask 195712  }
   0xf   :  { %v50_v19 = vpack.c.bf16 %v39_v17, %v38_v16  ;;  %v41_v21 = vld [vmem:[%s1025_s0 + $0x58] sm:$0xff]  ;;  %v42_v22 = vld [vmem:[%s1025_s0 + $0x60] sm:$0xff]  ;;  %v43_v23 = vld [vmem:[%s1025_s0 + $0x68] sm:$0xff]  ;;  %vm539_vm6 = vcmask 261312   ;;  %vm546_vm7 = vcmask 326912   ;;  %vm553_vm8 = vcmask 392512  }
  0x10   :  { %v51_v24 = vpack.c.bf16 %v41_v21, %v40_v20  ;;  %v52_v25 = vpack.c.bf16 %v43_v23, %v42_v22  ;;  %v44_v26 = vld [vmem:[%s1025_s0 + $0x70] sm:$0xff]  ;;  %v45_v27 = vld [vmem:[%s1025_s0 + $0x78] sm:$0xff]  ;;  %v641_v32 = vld [vmem:[%s1027_s2] ss:$0 sm:$0xff]  ;;  %vm560_vm9 = vcmask 458112   ;;  %vm567_vm10 = vcmask 523712  }
  0x11   :  { %711 = vmatpush3.bf16.msra.mxu1 %v740_v13  ;;  %v53_v28 = vpack.c.bf16 %v45_v27, %v44_v26  ;;  %v741_v29 = vld [vmem:[%s1028_s3 + $0x10] sm:$0xff]   ;;  %v742_v30 = vld [vmem:[%s1028_s3 + $0x18] ss:$0 sps:$4 sm:$0x11]   ;;  %v900_v26 = vld [vmem:[%s1029_s4] ss:$0 sm:$0xff] }
  0x12   :  { %712 = vmatprep.subr.bf16.mxu1 %v741_v29  ;;  %v285_v31 = vsel %vm283_vm1, %v742_v30, 0  ;;  %vm574_vm11 = vcmask 589312   ;;  %vm581_vm12 = vcmask 654912   ;;  %vm588_vm13 = vcmask 720512   ;;  %s768_s4 = smov [#allocation3]  }
  0x13   :  { %vm595_vm14 = vcmask 786112   ;;  %vm602_vm15 = vcmask 851712  }
  0x14   :  { %697 = vmatmul.mubr.msk.bf16.gmra.mrb[4].mxu0 %vm77_vm0, %v49_v18 }
  0x15   :  { %700 = vmatprep.mubr.msk.bf16.mxu0 %vm77_vm0, %v50_v19  ;;  %713 = vmatpush3.bf16.msra.mxu1 %v741_v29 }
  0x16   :  { %732 = vmatprep.subr.msk.bf16.mxu1 %vm283_vm1, %v742_v30  ;;  %vm616_vm1 = vcmask 982912  }
  0x19   :  { %715 = vmatpush3.bf16.msra.mxu1 %v285_v31 }
  0x1c   :  { %701 = vmatmul.mubr.msk.bf16.gmra.mrb[8].mxu0 %vm77_vm0, %v51_v24 }
  0x1d   :  { %704 = vmatprep.mubr.msk.bf16.mxu0 %vm77_vm0, %v52_v25  ;;  %v767_v25 = vmov 0  }
  0x1e   :  { %735 = vset.pattern.permute.xlu1 %v767_v25  ;;  %736 = vset.pattern.permute.xlu0 %v767_v25 }
  0x24   :  { %705 = vmatmul.mubr.msk.bf16.gmra.mrb[12].mxu0 %vm77_vm0, %v53_v28  ;;  %vm609_vm0 = vcmask 917312  }
  0xdf   :  { %v694_v33 = vpop.f32.mrb[0].mxu0 }
  0xe0   :  { %v145_v34 = vadd.f32 %v694_v33, %v641_v32  ;;  %v136_v35 = vpop.f32.mrb[1].mxu0 }
  0xe1   :  { %v137_v36 = vadd.f32 %v641_v32, %v136_v35  ;;  %v695_v37 = vpop.f32.mrb[2].mxu0 }
  0xe2   :  { %v148_v38 = vadd.f32 %v695_v37, %v641_v32  ;;  %v139_v39 = vpop.f32.mrb[3].mxu0  ;;  %v201_v41 = vmax.f32 %v145_v34, 0.0 }
  0xe3   :  { %v140_v40 = vadd.f32 %v641_v32, %v139_v39  ;;  %v199_v43 = vmax.f32 %v137_v36, 0.0 }
  0xe4   :  { %v202_v42 = vmax.f32 %v148_v38, 0.0 }
  0xe5   :  { %v200_v44 = vmax.f32 %v140_v40, 0.0 }
  0xe6   :  { %v216_v45 = vpack.c.bf16 %v202_v42, %v201_v41 }
  0xe7   :  { %v698_v46 = vpop.f32.mrb[4].mxu0  ;;  %v215_v47 = vpack.c.bf16 %v200_v44, %v199_v43 }
  0xe8   :  { %v161_v48 = vadd.f32 %v698_v46, %v641_v32  ;;  %v152_v49 = vpop.f32.mrb[5].mxu0 }
  0xe9   :  { %v153_v50 = vadd.f32 %v641_v32, %v152_v49  ;;  %v699_v51 = vpop.f32.mrb[6].mxu0  ;;  %716 = vmatprep.mubr.msk.bf16.mxu1 %vm258_vm2, %v215_v47 }
  0xea   :  { %v164_v52 = vadd.f32 %v699_v51, %v641_v32  ;;  %v155_v53 = vpop.f32.mrb[7].mxu0  ;;  %717 = vmatmul.mubr.msk.bf16.vlgmr.msra.gmra.mrb[0].mxu1 %vm258_vm2, %v216_v45  ;;  %v205_v55 = vmax.f32 %v161_v48, 0.0 }
  0xeb   :  { %v156_v54 = vadd.f32 %v641_v32, %v155_v53  ;;  %v203_v57 = vmax.f32 %v153_v50, 0.0 }
  0xec   :  { %v206_v56 = vmax.f32 %v164_v52, 0.0 }
  0xed   :  { %v204_v58 = vmax.f32 %v156_v54, 0.0 }
  0xee   :  { %v218_v59 = vpack.c.bf16 %v206_v56, %v205_v55 }
  0xef   :  { %v217_v60 = vpack.c.bf16 %v204_v58, %v203_v57  ;;  %v702_v61 = vpop.f32.mrb[8].mxu0 }
  0xf0   :  { %v177_v62 = vadd.f32 %v702_v61, %v641_v32  ;;  %v168_v63 = vpop.f32.mrb[9].mxu0 }
  0xf1   :  { %720 = vmatprep.mubr.msk.bf16.mxu1 %vm258_vm2, %v217_v60  ;;  %v169_v0 = vadd.f32 %v641_v32, %v168_v63  ;;  %v703_v1 = vpop.f32.mrb[10].mxu0 }
  0xf2   :  { %721 = vmatmul.mubr.msk.bf16.gmra.mrb[4].mxu1 %vm258_vm2, %v218_v59  ;;  %v209_v2 = vmax.f32 %v177_v62, 0.0  ;;  %v180_v3 = vadd.f32 %v703_v1, %v641_v32  ;;  %v171_v4 = vpop.f32.mrb[11].mxu0 }
  0xf3   :  { %v207_v5 = vmax.f32 %v169_v0, 0.0  ;;  %v172_v6 = vadd.f32 %v641_v32, %v171_v4 }
  0xf4   :  { %v210_v7 = vmax.f32 %v180_v3, 0.0 }
  0xf5   :  { %v208_v8 = vmax.f32 %v172_v6, 0.0 }
  0xf6   :  { %v220_v9 = vpack.c.bf16 %v210_v7, %v209_v2 }
  0xf7   :  { %v219_v10 = vpack.c.bf16 %v208_v8, %v207_v5  ;;  %v706_v11 = vpop.f32.mrb[12].mxu0 }
  0xf8   :  { %v193_v12 = vadd.f32 %v706_v11, %v641_v32  ;;  %v184_v13 = vpop.f32.mrb[13].mxu0 }
  0xf9   :  { %724 = vmatprep.mubr.msk.bf16.mxu1 %vm258_vm2, %v219_v10  ;;  %v185_v14 = vadd.f32 %v641_v32, %v184_v13  ;;  %v707_v15 = vpop.f32.mrb[14].mxu0 }
  0xfa   :  { %725 = vmatmul.mubr.msk.bf16.gmra.mrb[8].mxu1 %vm258_vm2, %v220_v9  ;;  %v213_v16 = vmax.f32 %v193_v12, 0.0  ;;  %v196_v17 = vadd.f32 %v707_v15, %v641_v32  ;;  %v187_v18 = vpop.f32.mrb[15].mxu0 }
  0xfb   :  { %v211_v19 = vmax.f32 %v185_v14, 0.0  ;;  %v188_v20 = vadd.f32 %v641_v32, %v187_v18  ;;  %v907_v32 = vld [vmem:[%s1030_s5] ss:$0 sm:$0xff]  ;;  %s633_s5 = sshll.u32 %s768_s4, 4  ;;  %s634_s5 = int_to_ptr.vmem [resolvable:$true] %s633_s5 }
  0xfc   :  { %v214_v21 = vmax.f32 %v196_v17, 0.0  ;;  %s743_s23 = scalar_lea.vmem %s634_s5, 16  ;;  %s747_s24 = scalar_lea.vmem %s634_s5, 32 }
  0xfd   :  { %v212_v22 = vmax.f32 %v188_v20, 0.0  ;;  %p744_p0 = scmp.ne.s32.totalorder %s634_s5, %s743_s23  ;;  %p748_p1 = scmp.lt.s32.totalorder %s634_s5, %s634_s5 }
  0xfe   :  { %v222_v23 = vpack.c.bf16 %v214_v21, %v213_v16  ;;  %p749_p2 = scmp.lt.s32.totalorder %s747_s24, %s743_s23 }
  0xff   :  { %v221_v24 = vpack.c.bf16 %v212_v22, %v211_v19 }
 0x100   :  { %p750_p3 = por %p749_p2, %p748_p1 }
 0x101   :  { %728 = vmatprep.mubr.msk.bf16.mxu1 %vm258_vm2, %v221_v24 }
 0x102   :  { %729 = vmatmul.mubr.msk.bf16.gmra.mrb[12].mxu1 %vm258_vm2, %v222_v23  ;;  %vm623_vm2 = vcmask 1048512   ;;  %p751_p4 = pnand %p750_p3, %p744_p0 }
 0x1bd   :  { %v718_v27 = vpop.f32.mrb[0].mxu1 }
 0x1be   :  { %v330_v28 = vadd.f32 %v718_v27, %v900_v26  ;;  %v321_v29 = vpop.f32.mrb[1].mxu1 }
 0x1bf   :  { %v322_v30 = vadd.f32 %v900_v26, %v321_v29  ;;  %v719_v31 = vpop.f32.mrb[2].mxu1 }
 0x1c0   :  { %v386_v33 = vmax.f32 %v330_v28, 0.0  ;;  %v333_v34 = vadd.f32 %v719_v31, %v900_v26  ;;  %v324_v35 = vpop.f32.mrb[3].mxu1  ;;  %v472_v31 = vld [vmem:[#allocation2] sm:$0x1] }
 0x1c1   :  { %v384_v36 = vmax.f32 %v322_v30, 0.0  ;;  %v325_v37 = vadd.f32 %v900_v26, %v324_v35 }
 0x1c2   :  { %v387_v38 = vmax.f32 %v333_v34, 0.0  ;;  %v409_v39 = vmul.f32 %v907_v32, %v386_v33 }
 0x1c3   :  { %v385_v40 = vmax.f32 %v325_v37, 0.0  ;;  %v407_v41 = vmul.f32 %v907_v32, %v384_v36 }
 0x1c4   :  { %v430_v42 = vsel %vm423_vm3, %v409_v39, 0.0  ;;  %v410_v43 = vmul.f32 %v907_v32, %v387_v38 }
 0x1c5   :  { %431 = vadd.xlane.f32.xlu1 %v430_v42  ;;  %v722_v44 = vpop.f32.mrb[4].mxu1  ;;  %v424_v45 = vsel %vm423_vm3, %v407_v41, 0.0  ;;  %v408_v46 = vmul.f32 %v907_v32, %v385_v40 }
 0x1c6   :  { %v346_v47 = vadd.f32 %v722_v44, %v900_v26  ;;  %v337_v48 = vpop.f32.mrb[5].mxu1  ;;  %425 = vadd.xlane.f32.xlu0 %v424_v45  ;;  %v433_v53 = vsel %vm423_vm3, %v410_v43, 0.0 }
 0x1c7   :  { %v338_v49 = vadd.f32 %v900_v26, %v337_v48  ;;  %v723_v50 = vpop.f32.mrb[6].mxu1  ;;  %v427_v57 = vsel %vm423_vm3, %v408_v46, 0.0 }
 0x1c8   :  { %v390_v51 = vmax.f32 %v346_v47, 0.0  ;;  %v340_v52 = vpop.f32.mrb[7].mxu1  ;;  %v349_v55 = vadd.f32 %v723_v50, %v900_v26 }
 0x1c9   :  { %v388_v54 = vmax.f32 %v338_v49, 0.0  ;;  %v341_v56 = vadd.f32 %v900_v26, %v340_v52  ;;  %434 = vadd.xlane.f32.xlu1 %v433_v53  ;;  %v478_v52 = vlaneseq }
 0x1ca   :  { %428 = vadd.xlane.f32.xlu0 %v427_v57  ;;  %v413_v58 = vmul.f32 %v907_v32, %v390_v51  ;;  %v391_v61 = vmax.f32 %v349_v55, 0.0 }
 0x1cb   :  { %v389_v59 = vmax.f32 %v341_v56, 0.0  ;;  %v411_v0 = vmul.f32 %v907_v32, %v388_v54  ;;  %v955_v55 = vshrl.u32 %v478_v52, 7  ;;  %v958_v57 = vand.u32 127, %v478_v52 }
 0x1cc   :  { %v442_v60 = vsel %vm423_vm3, %v413_v58, 0.0  ;;  %v414_v10 = vmul.f32 %v907_v32, %v391_v61 }
 0x1cd   :  { %v412_v62 = vmul.f32 %v907_v32, %v389_v59  ;;  %v726_v63 = vpop.f32.mrb[8].mxu1  ;;  %v436_v9 = vsel %vm423_vm3, %v411_v0, 0.0  ;;  %v480_v56 = vsub.s32 0, %v955_v55  ;;  %v527_v61 = vadd.s32 4294967280, %v958_v57 }
 0x1ce   :  { %443 = vadd.xlane.f32.xlu0 %v442_v60  ;;  %v362_v1 = vadd.f32 %v726_v63, %v900_v26  ;;  %v353_v2 = vpop.f32.mrb[9].mxu1  ;;  %v445_v16 = vsel %vm423_vm3, %v414_v10, 0.0  ;;  %v520_v60 = vadd.s32 4294967288, %v958_v57  ;;  %v541_v10 = vadd.s32 4294967264, %v958_v57 }
 0x1cf   :  { %v439_v3 = vsel %vm423_vm3, %v412_v62, 0.0  ;;  %v354_v4 = vadd.f32 %v900_v26, %v353_v2  ;;  %v727_v5 = vpop.f32.mrb[10].mxu1 }
 0x1d0   :  { %440 = vadd.xlane.f32.xlu1 %v439_v3  ;;  %v394_v6 = vmax.f32 %v362_v1, 0.0  ;;  %v365_v7 = vadd.f32 %v727_v5, %v900_v26  ;;  %v356_v8 = vpop.f32.mrb[11].mxu1  ;;  %v518_v1 = vsub.s32 %v958_v57, %v955_v55  ;;  %v523_v2 = vsub.s32 %v520_v60, %v955_v55 }
 0x1d1   :  { %v392_v12 = vmax.f32 %v354_v4, 0.0  ;;  %v357_v13 = vadd.f32 %v900_v26, %v356_v8  ;;  %v530_v4 = vsub.s32 %v527_v61, %v955_v55 }
 0x1d2   :  { %437 = vadd.xlane.f32.xlu0 %v436_v9  ;;  %v395_v11 = vmax.f32 %v365_v7, 0.0  ;;  %v417_v14 = vmul.f32 %v907_v32, %v394_v6  ;;  %v534_v7 = vadd.s32 4294967272, %v958_v57 }
 0x1d3   :  { %v393_v20 = vmax.f32 %v357_v13, 0.0  ;;  %v415_v23 = vmul.f32 %v907_v32, %v392_v12 }
 0x1d4   :  { %v418_v15 = vmul.f32 %v907_v32, %v395_v11  ;;  %v454_v21 = vsel %vm423_vm3, %v417_v14, 0.0  ;;  %v537_v13 = vsub.s32 %v534_v7, %v955_v55  ;;  %v548_v14 = vadd.s32 4294967256, %v958_v57 }
 0x1d5   :  { %v730_v17 = vpop.f32.mrb[12].mxu1  ;;  %v448_v28 = vsel %vm423_vm3, %v415_v23, 0.0  ;;  %v416_v30 = vmul.f32 %v907_v32, %v393_v20  ;;  %v555_v20 = vadd.s32 4294967248, %v958_v57 }
 0x1d6   :  { %446 = vadd.xlane.f32.xlu0 %v445_v16  ;;  %v369_v18 = vpop.f32.mrb[13].mxu1  ;;  %v457_v19 = vsel %vm423_vm3, %v418_v15, 0.0  ;;  %v378_v22 = vadd.f32 %v730_v17, %v900_v26  ;;  %v544_v17 = vsub.s32 %v541_v10, %v955_v55  ;;  %v551_v23 = vsub.s32 %v548_v14, %v955_v55 }
 0x1d7   :  { %v731_v24 = vpop.f32.mrb[14].mxu1  ;;  %v370_v29 = vadd.f32 %v900_v26, %v369_v18  ;;  %v451_v34 = vsel %vm423_vm3, %v416_v30, 0.0  ;;  %v569_v30 = vadd.s32 4294967232, %v958_v57 }
 0x1d8   :  { %v372_v25 = vpop.f32.mrb[15].mxu1  ;;  %v398_v27 = vmax.f32 %v378_v22, 0.0  ;;  %v381_v37 = vadd.f32 %v731_v24, %v900_v26 }
 0x1d9   :  { %v396_v33 = vmax.f32 %v370_v29, 0.0  ;;  %v373_v35 = vadd.f32 %v900_v26, %v372_v25  ;;  %v558_v25 = vsub.s32 %v555_v20, %v955_v55 }
 0x1da   :  { %455 = vadd.xlane.f32.xlu0 %v454_v21  ;;  %v421_v36 = vmul.f32 %v907_v32, %v398_v27  ;;  %v399_v41 = vmax.f32 %v381_v37, 0.0  ;;  %v562_v27 = vadd.s32 4294967240, %v958_v57 }
 0x1db   :  { %v397_v38 = vmax.f32 %v373_v35, 0.0  ;;  %v419_v40 = vmul.f32 %v907_v32, %v396_v33 }
 0x1dc   :  { %v466_v39 = vsel %vm423_vm3, %v421_v36, 0.0  ;;  %v422_v45 = vmul.f32 %v907_v32, %v399_v41  ;;  %v565_v36 = vsub.s32 %v562_v27, %v955_v55 }
 0x1dd   :  { %v460_v42 = vsel %vm423_vm3, %v419_v40, 0.0  ;;  %v420_v43 = vmul.f32 %v907_v32, %v397_v38 }
 0x1de   :  { %449 = vadd.xlane.f32.xlu0 %v448_v28  ;;  %v469_v46 = vsel %vm423_vm3, %v422_v45, 0.0 }
 0x1df   :  { %v463_v44 = vsel %vm423_vm3, %v420_v43, 0.0 }
 0x1e1   :  { %475 = vperm.xlu1 %735, %v472_v31  }
 0x1e2   :  { %452 = vadd.xlane.f32.xlu0 %v451_v34  ;;  %v576_v34 = vadd.s32 4294967224, %v958_v57 }
 0x1e4   :  { %v579_v41 = vsub.s32 %v576_v34, %v955_v55 }
 0x1e6   :  { %467 = vadd.xlane.f32.xlu0 %v466_v39  ;;  %v572_v39 = vsub.s32 %v569_v30, %v955_v55 }
 0x1ea   :  { %461 = vadd.xlane.f32.xlu0 %v460_v42 }
 0x1ee   :  { %464 = vadd.xlane.f32.xlu0 %v463_v44  ;;  %v583_v44 = vadd.s32 4294967216, %v958_v57 }
 0x1f0   :  { %v586_v52 = vsub.s32 %v583_v44, %v955_v55 }
 0x1f2   :  { %470 = vadd.xlane.f32.xlu0 %v469_v46 }
 0x205   :  { %458 = vadd.xlane.f32.xlu1 %v457_v19 }
 0x252   :  { %v432_v49 = vpop.xlane.xlu1 %431 }
 0x253   :  { %v426_v26 = vpop.xlane.xlu0 %425 }
 0x256   :  { %v435_v51 = vpop.xlane.xlu1 %434 }
 0x257   :  { %v429_v47 = vpop.xlane.xlu0 %428 }
 0x25b   :  { %v444_v48 = vpop.xlane.xlu0 %443 }
 0x25d   :  { %v441_v53 = vpop.xlane.xlu1 %440 }
 0x25f   :  { %v438_v50 = vpop.xlane.xlu0 %437 }
 0x261   :  { %v476_v32 = vpop.permute.xlu1 %475 }
 0x262   :  { %v962_v59 = vrot.slane %v476_v32, %v480_v56  ;;  %v618_v56 = vadd.s32 4294967176, %v958_v57 }
 0x263   :  { %v447_v54 = vpop.xlane.xlu0 %446 }
 0x264   :  { %v482_v63 = vadd.f32 %v962_v59, %v426_v26  ;;  %v483_v0 = vadd.f32 %v962_v59, %v429_v47  ;;  %v484_v3 = vadd.f32 %v962_v59, %v432_v49  ;;  %v485_v11 = vadd.f32 %v962_v59, %v435_v51 }
 0x265   :  { %v486_v15 = vadd.f32 %v962_v59, %v438_v50  ;;  %v487_v21 = vadd.f32 %v962_v59, %v441_v53  ;;  %v488_v28 = vadd.f32 %v962_v59, %v444_v48  ;;  %v489_v37 = vadd.f32 %v962_v59, %v447_v54 }
 0x266   :  { %v519_v5 = vrot.slane %v482_v63, %v518_v1  ;;  %v524_v6 = vrot.slane %v483_v0, %v523_v2  ;;  %v531_v9 = vrot.slane %v484_v3, %v530_v4  ;;  %v538_v19 = vrot.slane %v485_v11, %v537_v13 }
 0x267   :  { %v960_v58 = vpop.xlane.xlu0 %455  ;;  %v545_v24 = vrot.slane %v486_v15, %v544_v17  ;;  %v552_v33 = vrot.slane %v487_v21, %v551_v23  ;;  %v559_v38 = vrot.slane %v488_v28, %v558_v25  ;;  %v566_v46 = vrot.slane %v489_v37, %v565_v36 }
 0x268   :  { %v526_v12 = vsel %vm525_vm4, %v524_v6, %v519_v5  ;;  %v590_v26 = vadd.s32 4294967208, %v958_v57  ;;  %v597_v48 = vadd.s32 4294967200, %v958_v57  ;;  %v604_v51 = vadd.s32 4294967192, %v958_v57 }
 0x269   :  { %v533_v16 = vsel %vm532_vm5, %v531_v9, %v526_v12  ;;  %v492_v53 = vadd.f32 %v962_v59, %v960_v58  ;;  %v611_v54 = vadd.s32 4294967184, %v958_v57  ;;  %v621_v6 = vsub.s32 %v618_v56, %v955_v55 }
 0x26a   :  { %v540_v22 = vsel %vm539_vm6, %v538_v19, %v533_v16  ;;  %v593_v32 = vsub.s32 %v590_v26, %v955_v55  ;;  %v600_v61 = vsub.s32 %v597_v48, %v955_v55  ;;  %v607_v2 = vsub.s32 %v604_v51, %v955_v55 }
 0x26b   :  { %v450_v62 = vpop.xlane.xlu0 %449  ;;  %v547_v29 = vsel %vm546_vm7, %v545_v24, %v540_v22  ;;  %v587_v4 = vrot.slane %v492_v53, %v586_v52  ;;  %v614_v57 = vsub.s32 %v611_v54, %v955_v55 }
 0x26c   :  { %v554_v35 = vsel %vm553_vm8, %v552_v33, %v547_v29  ;;  %v490_v40 = vadd.f32 %v962_v59, %v450_v62 }
 0x26d   :  { %v561_v43 = vsel %vm560_vm9, %v559_v38, %v554_v35 }
 0x26e   :  { %v573_v47 = vrot.slane %v490_v40, %v572_v39  ;;  %v568_v49 = vsel %vm567_vm10, %v566_v46, %v561_v43 }
 0x26f   :  { %v453_v8 = vpop.xlane.xlu0 %452 }
 0x270   :  { %v491_v42 = vadd.f32 %v962_v59, %v453_v8  ;;  %v575_v60 = vsel %vm574_vm11, %v573_v47, %v568_v49 }
 0x272   :  { %v580_v50 = vrot.slane %v491_v42, %v579_v41 }
 0x273   :  { %v468_v18 = vpop.xlane.xlu0 %467 }
 0x274   :  { %v582_v1 = vsel %vm581_vm12, %v580_v50, %v575_v60  ;;  %v496_v5 = vadd.f32 %v962_v59, %v468_v18 }
 0x275   :  { %v589_v10 = vsel %vm588_vm13, %v587_v4, %v582_v1 }
 0x276   :  { %v615_v13 = vrot.slane %v496_v5, %v614_v57 }
 0x277   :  { %v462_v31 = vpop.xlane.xlu0 %461 }
 0x278   :  { %v494_v62 = vadd.f32 %v962_v59, %v462_v31 }
 0x27a   :  { %v601_v9 = vrot.slane %v494_v62, %v600_v61 }
 0x27b   :  { %v465_v45 = vpop.xlane.xlu0 %464 }
 0x27c   :  { %v495_v58 = vadd.f32 %v962_v59, %v465_v45 }
 0x27e   :  { %v608_v11 = vrot.slane %v495_v58, %v607_v2 }
 0x27f   :  { %v471_v63 = vpop.xlane.xlu0 %470 }
 0x280   :  { %v497_v7 = vadd.f32 %v962_v59, %v471_v63 }
 0x282   :  { %v622_v15 = vrot.slane %v497_v7, %v621_v6 }
 0x292   :  { %v459_v0 = vpop.xlane.xlu1 %458 }
 0x293   :  { %v493_v3 = vadd.f32 %v962_v59, %v459_v0 }
 0x295   :  { %v594_v8 = vrot.slane %v493_v3, %v593_v32 }
 0x297   :  { %v596_v12 = vsel %vm595_vm14, %v594_v8, %v589_v10 }
 0x298   :  { %v603_v14 = vsel %vm602_vm15, %v601_v9, %v596_v12 }
 0x299   :  { %v610_v16 = vsel %vm609_vm0, %v608_v11, %v603_v14 }
 0x29a   :  { %v617_v17 = vsel %vm616_vm1, %v615_v13, %v610_v16 }
 0x29b   :  { %v624_v55 = vsel %vm623_vm2, %v622_v15, %v617_v17 }
 0x29c   :  { %626 = vst [vmem:[#allocation3] sm:$0x1] %v624_v55 }
 0x29d   :  { %754 = shalt.err (!%p751_p4)
}
 0x29e   :  { %s755_s27 = scalar_lea.hbm %s1032_s7, 16 }
 0x29f   :  { %p756_p5 = scmp.ne.s32.totalorder %s1032_s7, %s755_s27  ;;  %p759_p6 = scmp.lt.u32.totalorder %s755_s27, %s1032_s7 }
 0x2a1   :  { %p761_p7 = pnand %p759_p6, %p756_p5 }
 0x2a3   :  { %764 = shalt.err (!%p761_p7)
}
 0x2a4   :  { %636 = dma.vmem_to_hbm [thread:$0]  %s634_s5, 16, %s1032_s7, [#allocation4]  }
 0x2a5   :  { %765 = dma.done.wait [#allocation4], 16  }
 0x2a6   :  { %766 = vsyncadd [#allocation4], 4294967280 }
 0x2a7   :  { %640 = vsyncpa [#allocation4], 1 }

</bundles_post_ra>
